<compile_context>
chip_gen: v6e
topology: v6e:2x2x1
jax: 0.10.0
libtpu: 0.0.40
codegen_flags: <defaults>
</compile_context>

<pallas_src>
import jax
import jax.numpy as jnp
from jax.experimental import pallas as pl
from jax.experimental.pallas import tpu as pltpu


LEAKY_SLOPE = 0.2
IN_EPS = 1e-5


def layer_epilogue_kernel(x_ref, noise_ref, nw_ref, scale_ref, shift_ref, o_ref):
    # x_ref:     (C_TILE, H*W)  activations for one (batch, channel-tile)
    # noise_ref: (1, H*W)       per-pixel noise (shared across channels)
    # nw_ref:    (C_TILE, 1)    per-channel noise weight
    # scale_ref: (C_TILE, 1)    style scale (already has +1.0 folded in)
    # shift_ref: (C_TILE, 1)    style shift
    x = x_ref[...]

    # NoiseLayer: x + weight.view(1,-1,1,1) * noise
    x = x + nw_ref[...] * noise_ref[...]

    # LeakyReLU(0.2)  (== where(x>=0, x, 0.2*x) for slope in (0,1))
    x = jnp.maximum(x, LEAKY_SLOPE * x)

    # InstanceNorm2d (affine=False, biased variance, eps=1e-5):
    # fused single-pass reduction over the lane (H*W) axis, f32 math.
    n_inv = jnp.float32(1.0 / x.shape[-1])
    mean = jnp.sum(x, axis=-1, keepdims=True) * n_inv
    ex2 = jnp.sum(x * x, axis=-1, keepdims=True) * n_inv
    var = jnp.maximum(ex2 - mean * mean, 0.0)
    x = (x - mean) * jax.lax.rsqrt(var + IN_EPS)

    # StyleMod: x * (scale + 1) + shift   (the +1 is folded into scale_ref)
    o_ref[...] = (x * scale_ref[...] + shift_ref[...]).astype(o_ref.dtype)


def _pick_c_tile(C, hw, itemsize, budget_bytes=40 * 1024 * 1024):
    """Largest channel tile whose double-buffered in+out blocks fit the budget."""
    def fits(ct):
        return 4 * ct * hw * itemsize <= budget_bytes   # 2 bufs x (in + out)
    if fits(C):
        return C
    best = None
    for ct in range(8, C, 8):               # divisors of C, multiples of 8
        if C % ct == 0 and fits(ct):
            best = ct
    if best is not None:
        return best
    for ct in range(8, C + 1, 8):           # fallback: smallest legal divisor
        if C % ct == 0:
            return ct
    return C


def layer_epilogue(x, noise, noise_weight, latent, w_scaled, b_scaled):
    """StyleGAN LayerEpilogue forward.

    x: (B,C,H,W), noise: (B,1,H,W), noise_weight: (C,), latent: (B,L),
    w_scaled: (L,2C) (= (style_linear.weight * w_mul).T), b_scaled: (2C,).
    """
    B, C, H, W = x.shape
    hw = H * W

    # ---- hoisted style matmul (tiny (B,L)x(L,2C): <1% MXU util in-kernel) ----
    style = latent @ w_scaled + b_scaled[None, :]            # (B, 2C)
    scale = (style[:, :C] + 1.0).reshape(B, C, 1)
    shift = style[:, C:].reshape(B, C, 1)

    x_flat = x.reshape(B, C, hw)
    noise_flat = noise.reshape(B, 1, hw)
    nw = noise_weight.reshape(C, 1)

    itemsize = x.dtype.itemsize
    c_tile = _pick_c_tile(C, hw, itemsize)
    n_ct = C // c_tile

    block_bytes = c_tile * hw * itemsize
    vmem_needed = (4 * block_bytes              # double-buffered x + out blocks
                   + 2 * hw * itemsize          # noise block
                   + 8 * c_tile * itemsize      # nw / scale / shift
                   + (2 << 20))                 # headroom
    vmem_limit = int(min(100 * 1024 * 1024, max(vmem_needed, 16 * 1024 * 1024)))

    cost = pl.CostEstimate(
        flops=10 * B * C * hw,
        transcendentals=B * C,                  # one rsqrt per (b, c)
        bytes_accessed=(2 * B * C * hw + B * hw + 3 * B * C + C) * itemsize,
    )

    out_flat = pl.pallas_call(
        layer_epilogue_kernel,
        out_shape=jax.ShapeDtypeStruct((B, C, hw), x.dtype),
        grid_spec=pltpu.PrefetchScalarGridSpec(
            num_scalar_prefetch=0,
            grid=(B, n_ct),
            in_specs=[
                pl.BlockSpec((None, c_tile, hw), lambda b, c: (b, c, 0)),
                pl.BlockSpec((None, 1, hw), lambda b, c: (b, 0, 0)),
                pl.BlockSpec((c_tile, 1), lambda b, c: (c, 0)),
                pl.BlockSpec((None, c_tile, 1), lambda b, c: (b, c, 0)),
                pl.BlockSpec((None, c_tile, 1), lambda b, c: (b, c, 0)),
            ],
            out_specs=pl.BlockSpec((None, c_tile, hw), lambda b, c: (b, c, 0)),
        ),
        compiler_params=pltpu.CompilerParams(
            dimension_semantics=("parallel", "parallel"),
            vmem_limit_bytes=vmem_limit,
        ),
        cost_estimate=cost,
    )(x_flat, noise_flat, nw, scale, shift)

    return out_flat.reshape(B, C, H, W)


def layer_epilogue_ref(x, noise, noise_weight, latent, w_scaled, b_scaled):
    """Plain-JAX reference matching the PyTorch semantics."""
    B, C, H, W = x.shape
    x = x + noise_weight.reshape(1, C, 1, 1) * noise
    x = jnp.where(x >= 0, x, LEAKY_SLOPE * x)
    mean = jnp.mean(x, axis=(2, 3), keepdims=True)
    var = jnp.mean((x - mean) ** 2, axis=(2, 3), keepdims=True)
    x = (x - mean) / jnp.sqrt(var + IN_EPS)
    style = latent @ w_scaled + b_scaled.reshape(1, -1)       # (B, 2C)
    scale = style[:, :C].reshape(B, C, 1, 1)
    shift = style[:, C:].reshape(B, C, 1, 1)
    return x * (scale + 1.0) + shift


if __name__ == "__main__":
    B, C, H, W = 2, 4, 16, 16
    L = 32  # dlatent_size

    key = jax.random.PRNGKey(0)
    kx, kn, knw, klat, kw = jax.random.split(key, 5)

    x = jax.random.normal(kx, (B, C, H, W), dtype=jnp.float32)
    noise = jax.random.normal(kn, (B, 1, H, W), dtype=jnp.float32)
    latent = jax.random.normal(klat, (B, L), dtype=jnp.float32)

    # NoiseLayer weight: PyTorch inits to zeros; use small nonzero values here
    # so the noise path is actually exercised (deterministic, in-script).
    noise_weight = 0.1 * jax.random.normal(knw, (C,), dtype=jnp.float32)

    # StyleMod linear (MyLinear, gain=1.0, use_wscale=True, lrmul=1):
    #   weight ~ N(0,1) of shape (2C, L), w_mul = L**-0.5, bias = 0, b_mul = 1.
    lin_weight = jax.random.normal(kw, (2 * C, L), dtype=jnp.float32)
    w_mul = L ** -0.5
    w_scaled = (lin_weight * w_mul).T          # (L, 2C), pre-scaled glue
    b_scaled = jnp.zeros((2 * C,), dtype=jnp.float32)

    out = layer_epilogue(x, noise, noise_weight, latent, w_scaled, b_scaled)
    out = jax.block_until_ready(out)

    ref = layer_epilogue_ref(x, noise, noise_weight, latent, w_scaled, b_scaled)
    assert out.shape == (B, C, H, W)
    assert jnp.allclose(out, ref, atol=1e-5, rtol=1e-5), "mismatch vs reference"

    print("KERNEL_OK")
</pallas_src>

<mosaic_0001>
module attributes {stable_mosaic.version = 11 : i64} {
  func.func @layer_epilogue_kernel(%arg0: i32, %arg1: i32, %arg2: memref<1x4x256xf32, #tpu.memory_space<vmem>>, %arg3: memref<1x1x256xf32, #tpu.memory_space<vmem>>, %arg4: memref<4x1xf32, #tpu.memory_space<vmem>>, %arg5: memref<1x4x1xf32, #tpu.memory_space<vmem>>, %arg6: memref<1x4x1xf32, #tpu.memory_space<vmem>>, %arg7: memref<1x4x256xf32, #tpu.memory_space<vmem>>) attributes {dimension_semantics = [#tpu.dimension_semantics<parallel>, #tpu.dimension_semantics<parallel>], iteration_bounds = array<i64: 2, 1>, scalar_prefetch = 0 : i64, scratch_operands = 0 : i64, tpu.core_type = #tpu.core_type<tc>, window_params = [{transform_indices = @transform_0, window_bounds = array<i64: 1, 4, 256>}, {transform_indices = @transform_1, window_bounds = array<i64: 1, 1, 256>}, {transform_indices = @transform_2, window_bounds = array<i64: 4, 1>}, {transform_indices = @transform_3, window_bounds = array<i64: 1, 4, 1>}, {transform_indices = @transform_4, window_bounds = array<i64: 1, 4, 1>}, {transform_indices = @transform_5, window_bounds = array<i64: 1, 4, 256>}]} {
    %c0 = arith.constant 0 : index
    %c0_0 = arith.constant 0 : index
    %c0_1 = arith.constant 0 : index
    %0 = vector.load %arg2[%c0, %c0_0, %c0_1] : memref<1x4x256xf32, #tpu.memory_space<vmem>>, vector<1x4x256xf32>
    %1 = vector.shape_cast %0 : vector<1x4x256xf32> to vector<4x256xf32>
    %c0_2 = arith.constant 0 : index
    %c0_3 = arith.constant 0 : index
    %2 = vector.load %arg4[%c0_2, %c0_3] : memref<4x1xf32, #tpu.memory_space<vmem>>, vector<4x1xf32>
    %c0_4 = arith.constant 0 : index
    %c0_5 = arith.constant 0 : index
    %c0_6 = arith.constant 0 : index
    %3 = vector.load %arg3[%c0_4, %c0_5, %c0_6] : memref<1x1x256xf32, #tpu.memory_space<vmem>>, vector<1x1x256xf32>
    %4 = vector.shape_cast %3 : vector<1x1x256xf32> to vector<1x256xf32>
    %5 = vector.broadcast %2 : vector<4x1xf32> to vector<4x256xf32>
    %6 = vector.broadcast %4 : vector<1x256xf32> to vector<4x256xf32>
    %7 = arith.mulf %5, %6 : vector<4x256xf32>
    %8 = arith.addf %1, %7 : vector<4x256xf32>
    %cst = arith.constant 2.000000e-01 : f32
    %9 = vector.broadcast %cst : f32 to vector<4x256xf32>
    %10 = arith.mulf %9, %8 : vector<4x256xf32>
    %11 = arith.maximumf %8, %10 : vector<4x256xf32>
    %cst_7 = arith.constant dense<0.000000e+00> : vector<4xf32>
    %12 = vector.multi_reduction <add>, %11, %cst_7 [1] : vector<4x256xf32> to vector<4xf32>
    %13 = vector.shape_cast %12 : vector<4xf32> to vector<4x1xf32>
    %cst_8 = arith.constant 3.906250e-03 : f32
    %14 = vector.broadcast %cst_8 : f32 to vector<4x1xf32>
    %15 = arith.mulf %13, %14 : vector<4x1xf32>
    %16 = arith.mulf %11, %11 : vector<4x256xf32>
    %cst_9 = arith.constant dense<0.000000e+00> : vector<4xf32>
    %17 = vector.multi_reduction <add>, %16, %cst_9 [1] : vector<4x256xf32> to vector<4xf32>
    %18 = vector.shape_cast %17 : vector<4xf32> to vector<4x1xf32>
    %cst_10 = arith.constant 3.906250e-03 : f32
    %19 = vector.broadcast %cst_10 : f32 to vector<4x1xf32>
    %20 = arith.mulf %18, %19 : vector<4x1xf32>
    %21 = arith.mulf %15, %15 : vector<4x1xf32>
    %22 = arith.subf %20, %21 : vector<4x1xf32>
    %cst_11 = arith.constant 0.000000e+00 : f32
    %23 = vector.broadcast %cst_11 : f32 to vector<4x1xf32>
    %24 = arith.maximumf %22, %23 : vector<4x1xf32>
    %25 = vector.broadcast %15 : vector<4x1xf32> to vector<4x256xf32>
    %26 = arith.subf %11, %25 : vector<4x256xf32>
    %cst_12 = arith.constant 9.99999974E-6 : f32
    %27 = vector.broadcast %cst_12 : f32 to vector<4x1xf32>
    %28 = arith.addf %24, %27 : vector<4x1xf32>
    %29 = math.rsqrt %28 : vector<4x1xf32>
    %30 = vector.broadcast %29 : vector<4x1xf32> to vector<4x256xf32>
    %31 = arith.mulf %26, %30 : vector<4x256xf32>
    %c0_13 = arith.constant 0 : index
    %c0_14 = arith.constant 0 : index
    %c0_15 = arith.constant 0 : index
    %32 = vector.load %arg5[%c0_13, %c0_14, %c0_15] : memref<1x4x1xf32, #tpu.memory_space<vmem>>, vector<1x4x1xf32>
    %33 = vector.shape_cast %32 : vector<1x4x1xf32> to vector<4x1xf32>
    %34 = vector.broadcast %33 : vector<4x1xf32> to vector<4x256xf32>
    %35 = arith.mulf %31, %34 : vector<4x256xf32>
    %c0_16 = arith.constant 0 : index
    %c0_17 = arith.constant 0 : index
    %c0_18 = arith.constant 0 : index
    %36 = vector.load %arg6[%c0_16, %c0_17, %c0_18] : memref<1x4x1xf32, #tpu.memory_space<vmem>>, vector<1x4x1xf32>
    %37 = vector.shape_cast %36 : vector<1x4x1xf32> to vector<4x1xf32>
    %38 = vector.broadcast %37 : vector<4x1xf32> to vector<4x256xf32>
    %39 = arith.addf %35, %38 : vector<4x256xf32>
    %c0_19 = arith.constant 0 : index
    %c0_20 = arith.constant 0 : index
    %c0_21 = arith.constant 0 : index
    %40 = vector.load %arg7[%c0_19, %c0_20, %c0_21] : memref<1x4x256xf32, #tpu.memory_space<vmem>>, vector<1x4x256xf32>
    %41 = vector.shape_cast %40 : vector<1x4x256xf32> to vector<4x256xf32>
    %42 = vector.shape_cast %39 : vector<4x256xf32> to vector<1x4x256xf32>
    tpu.vector_store %arg7[%c0_19, %c0_20, %c0_21], %42 {strides = array<i32>} : memref<1x4x256xf32, #tpu.memory_space<vmem>>, vector<1x4x256xf32>,
    return
  }
  func.func @transform_0(%arg0: i32, %arg1: i32) -> (i32, i32, i32) {
    %c0_i32 = arith.constant 0 : i32
    %c0_i32_0 = arith.constant 0 : i32
    return %arg0, %arg1, %c0_i32 : i32, i32, i32
  }
  func.func @transform_1(%arg0: i32, %arg1: i32) -> (i32, i32, i32) {
    %c0_i32 = arith.constant 0 : i32
    %c0_i32_0 = arith.constant 0 : i32
    %c0_i32_1 = arith.constant 0 : i32
    return %arg0, %c0_i32, %c0_i32_0 : i32, i32, i32
  }
  func.func @transform_2(%arg0: i32, %arg1: i32) -> (i32, i32) {
    %c0_i32 = arith.constant 0 : i32
    %c0_i32_0 = arith.constant 0 : i32
    return %arg1, %c0_i32 : i32, i32
  }
  func.func @transform_3(%arg0: i32, %arg1: i32) -> (i32, i32, i32) {
    %c0_i32 = arith.constant 0 : i32
    %c0_i32_0 = arith.constant 0 : i32
    return %arg0, %arg1, %c0_i32 : i32, i32, i32
  }
  func.func @transform_4(%arg0: i32, %arg1: i32) -> (i32, i32, i32) {
    %c0_i32 = arith.constant 0 : i32
    %c0_i32_0 = arith.constant 0 : i32
    return %arg0, %arg1, %c0_i32 : i32, i32, i32
  }
  func.func @transform_5(%arg0: i32, %arg1: i32) -> (i32, i32, i32) {
    %c0_i32 = arith.constant 0 : i32
    %c0_i32_0 = arith.constant 0 : i32
    return %arg0, %arg1, %c0_i32 : i32, i32, i32
  }
}

</mosaic_0001>

<bundles_post_ra>
// kernel: tpu_custom_call.1
= control target key start
LH: loop header
LB: loop body
LE: loop exit
PB: predicated region body
PF: predicated region fallthrough
CT: control target
= control target key end

     0   :  { %10 = vsyncpa [#allocation3], 0  ;;  %s907_s0 = inlined_call_operand.vmem [shape: f32[2,4,256], index: 0, kind: input, shape index: {}]   ;;  %s908_s1 = inlined_call_operand.vmem [shape: f32[2,1,256], index: 1, kind: input, shape index: {}]   ;;  %s909_s2 = inlined_call_operand.vmem [shape: f32[4,1], index: 2, kind: input, shape index: {}]   ;;  %s910_s3 = inlined_call_operand.vmem [shape: f32[2,4,1], index: 3, kind: input, shape index: {}]   ;;  %s911_s4 = inlined_call_operand.vmem [shape: f32[2,4,1], index: 4, kind: input, shape index: {}]   ;;  %s912_s5 = inlined_call_operand.hbm [shape: f32[2,4,256], index: 5, kind: output, shape index: {}]  }
   0x1   :  { %12 = vsyncpa [#allocation3 + $0x1], 0  ;;  %s787_s18 = smov 0   ;;  %s789_s19 = smov 0  }
   0x2   :  { %s791_s20 = smov 0   ;;  %s793_s21 = smov 0  }
   0x3   :  { %s795_s22 = smov 0   ;;  %s797_s23 = smov 0  }
   0x4 LB: > { %s596_s24 = sadd.s32 4294967295, %s752_s23   ;;  %s597_s25 = sadd.s32 4294967294, %s752_s23   ;;  %s752_s23 = sphi %s797_s23, %s18_s23   ;;  %s748_s22 = sphi %s795_s22, %s919_s22   ;;  %s744_s21 = sphi %s793_s21, %s918_s21   ;;  %s740_s20 = sphi %s791_s20, %s917_s20   ;;  %s736_s19 = sphi %s789_s19, %s916_s19   ;;  %s732_s18 = sphi %s787_s18, %s915_s18  }
   0x5   : > { %s30_s26 = sadd.s32 1, %s748_s22  ;;  %s175_s27 = sadd.s32 1, %s740_s20 }
   0x6   : > { %p32_p0 = scmp.ge.s32.totalorder %s30_s26, 2  ;;  %p185_p1 = scmp.ne.s32.totalorder %s740_s20, %s736_s19 }
   0x7   : > { %p186_p2 = scmp.eq.s32.totalorder %s596_s24, 1  ;;  %p191_p3 = scmp.ne.s32.totalorder %s736_s19, %s732_s18 }
   0x8   : > { %s921_s26 = smov (%p32_p0, %s30_s26), 0  ;;  %p192_p5 = scmp.eq.s32.totalorder %s597_s25, 1 }
   0x9   : > { %p827_p4 = por %p186_p2, %p185_p1  ;;  %s170_s29 = ssub.s32 %s748_s22, %s921_s26 }
   0xa   : > { %p601_p6 = scmp.ge.s32.totalorder %s752_s23, 1  ;;  %p173_p7 = scmp.eq.s32.totalorder %s170_s29, 0 }
   0xb   : > { %p834_p8 = por %p192_p5, %p191_p3  ;;  %p256_p9 = scmp.lt.s32.totalorder %s752_s23, 3 }
   0xc   : > { %s840_s6 = scalar_select %p173_p7, %s740_s20, %s175_s27  }
   0xd   : > { %p257_p10 = pnand %p601_p6, %p256_p9 }
   0xe   : > { %p310_p11 = scmp.lt.s32.totalorder (!%p257_p10), %s744_s21, 1  ;;  %s614_s12 = sshll.u32 (!%p257_p10), %s744_s21, 7 }
   0xf   : > { %260 = sbr.rel (%p257_p10) target bundleno = 344 (0x158), region = 40  ;;  %s756_s27 = smov (!%p257_p10), [#allocation2]  }
  0x14   : > { %v342_v0 = vld [vmem:[%s909_s2] sm:$0xf]  ;;  %v754_v1 = vmov 0   ;;  %s847_s9 = scalar_select %p310_p11, %s744_s21, 1  ;;  %v350_v3 = vlaneseq  ;;  %vm372_vm0 = vcmask 1043456  }
  0x15   : > { %672 = vset.pattern.permute.xlu0 %v754_v1  ;;  %673 = vset.pattern.permute.xlu1 %v754_v1  ;;  %v755_v37 = vmov 839922192  }
  0x16   : > { %346 = vperm.xlu0 %672, %v342_v0   ;;  %s606_s10 = sshll.u32 %s847_s9, 2  ;;  %s605_s14 = sshll.u32 %s847_s9, 1  ;;  %v351_v4 = vshrl.u32 %v350_v3, 7  ;;  %v394_v38 = vunpack.c.l.s4 %v755_v37 }
  0x17   : > { %s333_s13 = scalar_lea.vmem %s910_s3, %s606_s10  ;;  %s322_s17 = scalar_lea.vmem %s908_s1, %s605_s14 }
  0x18   : > { %v414_v2 = vld [vmem:[%s333_s13] sm:$0xf]  ;;  %v352_v5 = vsub.s32 0, %v351_v4  ;;  %v356_v6 = vsub.s32 1, %v351_v4  ;;  %s613_s24 = sshll.u32 %s847_s9, 3  ;;  %s340_s11 = scalar_lea.vmem %s911_s4, %s606_s10  ;;  %v395_v39 = vunpack.c.0.s8 %v394_v38 }
  0x19   : > { %417 = vperm.xlu1 %673, %v414_v2   ;;  %v343_v7 = vld [vmem:[%s322_s17] sm:$0x3]  ;;  %s318_s29 = scalar_lea.vmem %s907_s0, %s613_s24  ;;  %s307_s9 = sand.u32 1, %s736_s19  }
  0x1a   : > { %v353_v8 = vrot.slane %v343_v7, %v352_v5  ;;  %v357_v9 = vrot.slane %v343_v7, %v356_v6  ;;  %v341_v13 = vld [vmem:[%s318_s29] sm:$0xff]  ;;  %v398_v40 = vsub.s32 %v395_v39, %v351_v4  ;;  %s602_s10 = sshll.u32 %s307_s9, 3  ;;  %s458_s17 = scalar_lea.hbm %s912_s5, %s614_s12 }
  0x1b   : > { %v428_v27 = vld [vmem:[%s340_s11] sm:$0xf]  ;;  %s309_s13 = scalar_lea.vmem [#allocation2], %s602_s10  ;;  %s444_s24 = scalar_lea.sflag [#allocation3], %s307_s9 }
  0x1c   : > { %s460_s14 = sshll.u32 %s309_s13, 4  ;;  %s680_s29 = sshll.u32 %s756_s27, 4  ;;  %s461_s14 = int_to_ptr.vmem [resolvable:$true] %s460_s14  ;;  %s681_s29 = int_to_ptr.vmem [resolvable:$false] %s680_s29 }
  0x1d   : > { %s676_s25 = scalar_lea.vmem %s461_s14, 128  ;;  %s682_s21 = scalar_lea.vmem %s681_s29, 256 }
  0x1e   : > { %p677_p12 = scmp.ne.s32.totalorder %s461_s14, %s676_s25  ;;  %p683_p1 = scmp.lt.s32.totalorder %s461_s14, %s681_s29 }
  0x1f   : > { %p684_p2 = scmp.lt.s32.totalorder %s682_s21, %s676_s25 }
  0x20   : > { %p678_p13 = pnand %p677_p12, %p827_p4 }
  0x21   : > { %p685_p3 = por %p684_p2, %p683_p1 }
  0x22   : > { %p679_p0 = pneg %p678_p13 }
  0x24   : > { %p686_p5 = pnand %p685_p3, %p679_p0 }
  0x91   : > { %v347_v10 = vpop.permute.xlu0 %346 }
  0x92   : > { %v360_v11 = vmul.f32 %v353_v8, %v347_v10  ;;  %v361_v12 = vmul.f32 %v357_v9, %v347_v10 }
  0x94   : > { %v364_v14 = vcombine.low %v360_v11, %v361_v12  ;;  %v418_v28 = vpop.permute.xlu1 %417 }
  0x95   : > { %v425_v46 = vrot.slane %v418_v28, %v398_v40 }
  0x96   : > { %v366_v15 = vadd.f32 %v364_v14, %v341_v13 }
  0x98   : > { %v367_v16 = vmul.f32 0.2, %v366_v15 }
  0x9a   : > { %v368_v17 = vmax.f32 %v366_v15, %v367_v16 }
  0x9c   : > { %v370_v18 = vcombine.high %v368_v17, %v368_v17  ;;  %v379_v19 = vmul.f32 %v368_v17, %v368_v17  ;;  %v373_v20 = vsel %vm372_vm0, %v368_v17, 0.0 }
  0x9e   : > { %v374_v21 = vsel %vm372_vm0, %v370_v18, 0.0  ;;  %v381_v22 = vcombine.high %v379_v19, %v379_v19  ;;  %v383_v24 = vsel %vm372_vm0, %v379_v19, 0.0 }
  0x9f   : > { %v375_v23 = vadd.f32 %v374_v21, %v373_v20 }
  0xa0   : > { %v384_v25 = vsel %vm372_vm0, %v381_v22, 0.0 }
  0xa1   : > { %376 = vadd.xlane.f32.xlu0 %v375_v23  ;;  %v385_v26 = vadd.f32 %v384_v25, %v383_v24 }
  0xa3   : > { %386 = vadd.xlane.f32.xlu1 %v385_v26 }
  0xb4   : > { %431 = vperm.xlu1 %673, %v428_v27  }
 0x12a   : > { %v377_v29 = vpop.xlane.xlu0 %376 }
 0x12b   : > { %v378_v30 = vmul.f32 0.00390625, %v377_v29 }
 0x12c   : > { %v387_v31 = vpop.xlane.xlu1 %386 }
 0x12d   : > { %v389_v32 = vmul.f32 %v378_v30, %v378_v30  ;;  %v388_v33 = vmul.f32 0.00390625, %v387_v31  ;;  %v399_v41 = vrot.slane %v378_v30, %v398_v40 }
 0x12f   : > { %v390_v34 = vsub.f32 %v388_v33, %v389_v32  ;;  %v401_v43 = vsub.f32 %v368_v17, %v399_v41 }
 0x130   : > { %v432_v45 = vpop.permute.xlu1 %431 }
 0x131   : > { %v391_v35 = vmax.f32 %v390_v34, 0.0  ;;  %v439_v49 = vrot.slane %v432_v45, %v398_v40 }
 0x133   : > { %v402_v36 = vadd.f32 1e-05, %v391_v35 }
 0x135   : > { %674 = vrsqrt.f32 %v402_v36 }
 0x142   : > { %v675_v42 = vpop.eup %674 }
 0x143   : > { %v411_v44 = vrot.slane %v675_v42, %v398_v40 }
 0x145   : > { %v413_v47 = vmul.f32 %v411_v44, %v401_v43 }
 0x147   : > { %v427_v48 = vmul.f32 %v425_v46, %v413_v47 }
 0x149   : > { %v441_v50 = vadd.f32 %v439_v49, %v427_v48 }
 0x14b   : > { %442 = vst [vmem:[%s309_s13] sm:$0xff] %v441_v50 }
 0x14c   : > { %689 = shalt.err (!%p686_p5)
}
 0x14d   : > { %s690_s7 = scalar_lea.hbm %s458_s17, 128  ;;  %s694_s9 = scalar_lea.hbm %s912_s5, 256 }
 0x14e   : > { %p691_p6 = scmp.ne.s32.totalorder %s458_s17, %s690_s7  ;;  %p695_p10 = scmp.lt.s32.totalorder %s458_s17, %s912_s5 }
 0x14f   : > { %p696_p11 = scmp.lt.s32.totalorder %s694_s9, %s690_s7 }
 0x150   : > { %p692_p7 = pnand %p691_p6, %p827_p4 }
 0x151   : > { %p697_p12 = por %p696_p11, %p695_p10 }
 0x152   : > { %p693_p9 = pneg %p692_p7 }
 0x154   : > { %p698_p13 = pnand %p697_p12, %p693_p9 }
 0x156   : > { %701 = shalt.err (!%p698_p13)
}
 0x157   : > { %615 = dma.vmem_to_hbm [thread:$0]  (%p827_p4), %s461_s14, 128, %s458_s17, %s444_s24  }
 0x158 PF: > { %p621_p0 = scmp.ge.s32.totalorder %s752_s23, 2  ;;  %s472_s13 = sand.u32 1, %s732_s18  }
 0x159   : > { %s473_s15 = scalar_lea.sflag [#allocation3], %s472_s13 }
 0x15a   : > { %p618_p1 = pnand %p621_p0, %p834_p8 }
 0x15c   : > { %p619_p2 = pneg %p618_p1 }
 0x15e   : > { %727 = dma.done.wait (%p619_p2), %s473_s15, 128  }
 0x15f   : > { %729 = vsyncadd (%p619_p2), %s473_s15, 4294967168  ;;  %s18_s23 = sadd.s32 1, %s752_s23   ;;  %s915_s18 = smov %s736_s19 }
 0x160   : > { %p15_p3 = scmp.ge.s32.totalorder %s18_s23, 4   ;;  %s916_s19 = smov %s740_s20 }
 0x161   : > { %s917_s20 = smov %s840_s6  ;;  %s918_s21 = smov %s748_s22 }
 0x162   : > { %s919_s22 = smov %s921_s26  ;;  %17 = sbr.rel (!%p15_p3) target bundleno = 4 (0x4), region = 87 }
 0x167   :  { %478 = vsyncpa [#allocation3], 1 }
 0x168   :  { %480 = vsyncpa [#allocation3 + $0x1], 1 }

</bundles_post_ra>
